<compile_context>
chip_gen: v7x
topology: tpu7x:2x2x1
jax: 0.10.0
libtpu: 0.0.40
codegen_flags: <defaults>
</compile_context>

<pallas_src>
import functools

import jax
import jax.numpy as jnp
from jax.experimental import pallas as pl
from jax.experimental.pallas import tpu as pltpu


_VMEM_LIMIT_BYTES = 32 * 1024 * 1024          # safe on v5e/v6e/v7x
_DEFAULT_BUDGET_BYTES = 20 * 1024 * 1024      # working-set budget under the limit


# ---------------------------------------------------------------------------
# Softmax-over-height helper (logits laid out channel-major: index = h*C + c).
# Runs once per batch entry; static sublane slices, no reshape.
# ---------------------------------------------------------------------------
def _height_softmax_scales(logits, height, C):
    cols = [logits[h * C:(h + 1) * C, :] for h in range(height)]   # (C, 1) each
    m = cols[0]
    for h in range(1, height):
        m = jnp.maximum(m, cols[h])
    exps = [jnp.exp(c - m) for c in cols]
    denom = exps[0]
    for h in range(1, height):
        denom = denom + exps[h]
    inv = pl.reciprocal(denom, approx=True)                        # EUP slot
    return [e * inv for e in exps]                                 # (C, 1) each


def _mlp_logits(pooled, w1_ref, w2_ref):
    w1 = w1_ref[...].astype(jnp.float32)                           # (d, C)
    w2 = w2_ref[...].astype(jnp.float32)                           # (height*C, d)
    hidden = jnp.dot(w1, pooled, preferred_element_type=jnp.float32)
    hidden = jnp.maximum(hidden, 0.0)                              # ReLU, (d, 1)
    return jnp.dot(w2, hidden, preferred_element_type=jnp.float32)  # (height*C, 1)


# ---------------------------------------------------------------------------
# Fused single-pass kernel: pooling + MLP + softmax + weighted sum, grid (B,)
# ---------------------------------------------------------------------------
def _fused_kernel(*refs, height, inv_hw):
    feat_refs = refs[:height]          # each (1, C, HW)
    w1_ref = refs[height]              # (d, C)
    w2_ref = refs[height + 1]          # (height*C, d)
    o_ref = refs[height + 2]           # (1, C, HW)
    C = o_ref.shape[1]

    # Global average pool of feats_sum, folded per-branch (no (C,HW) f32 temp).
    pooled = jnp.sum(feat_refs[0][0].astype(jnp.float32), axis=-1, keepdims=True)
    for h in range(1, height):
        pooled = pooled + jnp.sum(
            feat_refs[h][0].astype(jnp.float32), axis=-1, keepdims=True)
    pooled = pooled * inv_hw                                       # (C, 1)

    logits = _mlp_logits(pooled, w1_ref, w2_ref)
    scales = _height_softmax_scales(logits, height, C)             # (C, 1) each

    acc = feat_refs[0][0].astype(jnp.float32) * scales[0]
    for h in range(1, height):
        acc = acc + feat_refs[h][0].astype(jnp.float32) * scales[h]
    o_ref[0] = acc.astype(o_ref.dtype)


# ---------------------------------------------------------------------------
# Stage 1: pooled sums over HW tiles -> MLP -> softmax over height
# ---------------------------------------------------------------------------
def _attn_kernel(*refs, height, inv_hw):
    feat_refs = refs[:height]          # each (1, C, T_HW)
    w1_ref = refs[height]              # (d, C)
    w2_ref = refs[height + 1]          # (height*C, d)
    attn_ref = refs[height + 2]        # (1, height*C, 1)  output
    acc_ref = refs[height + 3]         # (C, 1) f32 scratch (pooled sum)

    t = pl.program_id(1)

    @pl.when(t == 0)
    def _():
        acc_ref[...] = jnp.zeros_like(acc_ref)

    # Fold the pooling: per-branch lane reduction accumulated into (C, 1).
    part = jnp.sum(feat_refs[0][0].astype(jnp.float32), axis=-1, keepdims=True)
    for h in range(1, height):
        part = part + jnp.sum(
            feat_refs[h][0].astype(jnp.float32), axis=-1, keepdims=True)
    acc_ref[...] += part

    @pl.when(t == pl.num_programs(1) - 1)
    def _():
        C = acc_ref.shape[0]
        pooled = acc_ref[...] * inv_hw                             # (C, 1)
        logits = _mlp_logits(pooled, w1_ref, w2_ref)
        scales = _height_softmax_scales(logits, height, C)
        for h in range(height):
            attn_ref[0, h * C:(h + 1) * C, :] = scales[h]


# ---------------------------------------------------------------------------
# Stage 2: out[b] = sum_h in_feats[h][b] * attn[b, h]   (streamed over HW tiles)
# ---------------------------------------------------------------------------
def _fuse_kernel(*refs, height):
    attn_ref = refs[0]                 # (1, height*C, 1) f32
    feat_refs = refs[1:1 + height]     # each (1, C, T_HW)
    o_ref = refs[1 + height]           # (1, C, T_HW)
    C = o_ref.shape[1]

    a = attn_ref[0]                                                # (height*C, 1)
    acc = feat_refs[0][0].astype(jnp.float32) * a[0:C, :]
    for h in range(1, height):
        acc = acc + feat_refs[h][0].astype(jnp.float32) * a[h * C:(h + 1) * C, :]
    o_ref[0] = acc.astype(o_ref.dtype)


# ---------------------------------------------------------------------------
# Tiling / path selection
# ---------------------------------------------------------------------------
def _fused_fits(hw, c, height, in_bytes, out_bytes, budget):
    # double-buffered inputs + double-buffered output + ~2 f32 temps
    per_batch = c * hw * (2 * height * in_bytes + 2 * out_bytes + 2 * 4)
    return per_batch <= budget


def _pick_hw_tile(hw, c, height, in_bytes, out_bytes, budget):
    """Largest lane-dense (multiple-of-128) HW tile that divides HW and keeps
    the double-buffered working set under `budget`."""
    if hw % 128 != 0:
        # Tiny / odd feature maps: single full-HW block.
        # TODO(synk): for very large HW not divisible by 128, add a padded /
        # masked lane-dense tiling path instead of one full-HW block.
        return hw
    per_elem = c * (2 * height * in_bytes + 2 * out_bytes + 2 * 4)
    for t in (2048, 1024, 512, 256, 128):
        if hw % t == 0 and t * per_elem <= budget:
            return t
    return 128


def skfusion(in_feats, w1, w2, *, vmem_budget_bytes=_DEFAULT_BUDGET_BYTES):
    """in_feats: list of `height` arrays (B, C, H, W); w1: (d, C); w2: (height*C, d)."""
    height = len(in_feats)
    B, C, H, W = in_feats[0].shape
    d = w1.shape[0]
    hw = H * W
    in_bytes = jnp.dtype(in_feats[0].dtype).itemsize
    out_bytes = in_bytes

    # Metadata-only reshape (no HBM copy); branches stay separate (no stack).
    feats = [f.reshape(B, C, hw) for f in in_feats]
    w_specs = [
        pl.BlockSpec((d, C), lambda b, t: (0, 0)),
        pl.BlockSpec((height * C, d), lambda b, t: (0, 0)),
    ]

    # ---- Fused single-pass path (each branch read from HBM exactly once) ---
    if _fused_fits(hw, C, height, in_bytes, out_bytes, vmem_budget_bytes):
        feat_spec = pl.BlockSpec((1, C, hw), lambda b: (b, 0, 0))
        out = pl.pallas_call(
            functools.partial(_fused_kernel, height=height, inv_hw=1.0 / hw),
            out_shape=jax.ShapeDtypeStruct((B, C, hw), in_feats[0].dtype),
            grid=(B,),
            in_specs=[feat_spec] * height + [
                pl.BlockSpec((d, C), lambda b: (0, 0)),
                pl.BlockSpec((height * C, d), lambda b: (0, 0)),
            ],
            out_specs=pl.BlockSpec((1, C, hw), lambda b: (b, 0, 0)),
            compiler_params=pltpu.CompilerParams(
                dimension_semantics=("parallel",),
                vmem_limit_bytes=_VMEM_LIMIT_BYTES),
        )(*feats, w1, w2)
        return out.reshape(B, C, H, W)

    # ---- Two-stage tiled path ----------------------------------------------
    t_hw = _pick_hw_tile(hw, C, height, in_bytes, out_bytes, vmem_budget_bytes)
    n_t = hw // t_hw
    feat_spec = pl.BlockSpec((1, C, t_hw), lambda b, t: (b, 0, t))

    # Stage 1: attention weights, shape (B, height*C, 1), f32
    attn = pl.pallas_call(
        functools.partial(_attn_kernel, height=height, inv_hw=1.0 / hw),
        out_shape=jax.ShapeDtypeStruct((B, height * C, 1), jnp.float32),
        grid=(B, n_t),
        in_specs=[feat_spec] * height + w_specs,
        out_specs=pl.BlockSpec((1, height * C, 1), lambda b, t: (b, 0, 0)),
        scratch_shapes=[pltpu.VMEM((C, 1), jnp.float32)],
        compiler_params=pltpu.CompilerParams(
            dimension_semantics=("parallel", "arbitrary"),
            vmem_limit_bytes=_VMEM_LIMIT_BYTES),
    )(*feats, w1, w2)

    # Stage 2: weighted sum of branches
    out = pl.pallas_call(
        functools.partial(_fuse_kernel, height=height),
        out_shape=jax.ShapeDtypeStruct((B, C, hw), in_feats[0].dtype),
        grid=(B, n_t),
        in_specs=[pl.BlockSpec((1, height * C, 1), lambda b, t: (b, 0, 0))]
                 + [feat_spec] * height,
        out_specs=pl.BlockSpec((1, C, t_hw), lambda b, t: (b, 0, t)),
        compiler_params=pltpu.CompilerParams(
            dimension_semantics=("parallel", "parallel"),
            vmem_limit_bytes=_VMEM_LIMIT_BYTES),
    )(attn, *feats)
    return out.reshape(B, C, H, W)


def skfusion_ref(in_feats, w1, w2):
    """Pure-JAX reference mirroring the PyTorch forward."""
    height = len(in_feats)
    B, C, H, W = in_feats[0].shape
    x = jnp.stack(in_feats, axis=1)                       # (B, height, C, H, W)
    feats_sum = jnp.sum(x, axis=1)                        # (B, C, H, W)
    pooled = jnp.mean(feats_sum, axis=(2, 3))             # (B, C)
    hidden = jnp.maximum(pooled @ w1.T, 0.0)              # (B, d)
    attn = hidden @ w2.T                                  # (B, height*C)
    attn = attn.reshape(B, height, C)
    attn = jax.nn.softmax(attn, axis=1)                   # softmax over height
    return jnp.sum(x * attn[:, :, :, None, None], axis=1)


def _run_case(key, B, C, H, W, height, reduction, **kw):
    d = max(C // reduction, 4)
    keys = jax.random.split(key, height + 2)
    in_feats = [jax.random.normal(keys[i], (B, C, H, W), dtype=jnp.float32)
                for i in range(height)]
    w1 = jax.random.normal(keys[height], (d, C), dtype=jnp.float32) * 0.1
    w2 = jax.random.normal(keys[height + 1], (C * height, d),
                           dtype=jnp.float32) * 0.1

    out = jax.block_until_ready(skfusion(in_feats, w1, w2, **kw))
    ref = skfusion_ref(in_feats, w1, w2)
    assert out.shape == (B, C, H, W)
    # Tolerance 2e-3: pl.reciprocal(approx=True) is used for the softmax
    # denominator; it runs once per batch, off the hot loop.
    assert jnp.allclose(out, ref, rtol=2e-3, atol=2e-3), (
        f"max abs diff {jnp.max(jnp.abs(out - ref))}"
    )


if __name__ == "__main__":
    key = jax.random.PRNGKey(0)
    k0, k1, k2 = jax.random.split(key, 3)

    # Tiny map (HW=64): fused single-pass path.
    _run_case(k0, B=2, C=32, H=8, W=8, height=2, reduction=8)
    # Force the two-stage path with a small VMEM budget: HW=2048 -> 256-wide
    # lane-dense tiles, 8 HW tiles per batch, 3 branches -> exercises the
    # pooled-accumulator reduction across tiles + streamed fusion.
    _run_case(k1, B=2, C=16, H=32, W=64, height=3, reduction=8,
              vmem_budget_bytes=256 * 1024)
    # Two-stage fallback with a non-128-divisible HW (single full-HW block).
    _run_case(k2, B=2, C=32, H=8, W=8, height=2, reduction=8,
              vmem_budget_bytes=1024)

    print("KERNEL_OK")
</pallas_src>

<mosaic_0001>
module attributes {stable_mosaic.version = 11 : i64} {
  func.func @_fused_kernel(%arg0: i32, %arg1: memref<1x32x64xf32, #tpu.memory_space<vmem>>, %arg2: memref<1x32x64xf32, #tpu.memory_space<vmem>>, %arg3: memref<4x32xf32, #tpu.memory_space<vmem>>, %arg4: memref<64x4xf32, #tpu.memory_space<vmem>>, %arg5: memref<1x32x64xf32, #tpu.memory_space<vmem>>) attributes {dimension_semantics = [#tpu.dimension_semantics<parallel>], iteration_bounds = array<i64: 2>, scalar_prefetch = 0 : i64, scratch_operands = 0 : i64, tpu.core_type = #tpu.core_type<tc>, window_params = [{transform_indices = @transform_0, window_bounds = array<i64: 1, 32, 64>}, {transform_indices = @transform_1, window_bounds = array<i64: 1, 32, 64>}, {pipeline_mode = #tpu.pipeline_mode<synchronous>, transform_indices = @transform_2, window_bounds = array<i64: 4, 32>}, {pipeline_mode = #tpu.pipeline_mode<synchronous>, transform_indices = @transform_3, window_bounds = array<i64: 64, 4>}, {transform_indices = @transform_4, window_bounds = array<i64: 1, 32, 64>}]} {
    %c0 = arith.constant 0 : index
    %c0_0 = arith.constant 0 : index
    %c0_1 = arith.constant 0 : index
    %0 = vector.load %arg1[%c0, %c0_0, %c0_1] : memref<1x32x64xf32, #tpu.memory_space<vmem>>, vector<1x32x64xf32>
    %1 = vector.shape_cast %0 : vector<1x32x64xf32> to vector<32x64xf32>
    %cst = arith.constant dense<0.000000e+00> : vector<32xf32>
    %2 = vector.multi_reduction <add>, %1, %cst [1] : vector<32x64xf32> to vector<32xf32>
    %3 = vector.shape_cast %2 : vector<32xf32> to vector<32x1xf32>
    %c0_2 = arith.constant 0 : index
    %c0_3 = arith.constant 0 : index
    %c0_4 = arith.constant 0 : index
    %4 = vector.load %arg2[%c0_2, %c0_3, %c0_4] : memref<1x32x64xf32, #tpu.memory_space<vmem>>, vector<1x32x64xf32>
    %5 = vector.shape_cast %4 : vector<1x32x64xf32> to vector<32x64xf32>
    %cst_5 = arith.constant dense<0.000000e+00> : vector<32xf32>
    %6 = vector.multi_reduction <add>, %5, %cst_5 [1] : vector<32x64xf32> to vector<32xf32>
    %7 = vector.shape_cast %6 : vector<32xf32> to vector<32x1xf32>
    %8 = arith.addf %3, %7 : vector<32x1xf32>
    %cst_6 = arith.constant 1.562500e-02 : f32
    %9 = vector.broadcast %cst_6 : f32 to vector<32x1xf32>
    %10 = arith.mulf %8, %9 : vector<32x1xf32>
    %c0_7 = arith.constant 0 : index
    %c0_8 = arith.constant 0 : index
    %11 = vector.load %arg3[%c0_7, %c0_8] : memref<4x32xf32, #tpu.memory_space<vmem>>, vector<4x32xf32>
    %c0_9 = arith.constant 0 : index
    %c0_10 = arith.constant 0 : index
    %12 = vector.load %arg4[%c0_9, %c0_10] : memref<64x4xf32, #tpu.memory_space<vmem>>, vector<64x4xf32>
    %cst_11 = arith.constant dense<0.000000e+00> : vector<4x1xf32>
    %13 = tpu.matmul %11, %10, %cst_11 {dimension_numbers = #tpu.dot_dimension_numbers<[1], [0], [0], [1], [0, 0, 1, 1], [], []>} : vector<4x32xf32>, vector<32x1xf32>, vector<4x1xf32> -> vector<4x1xf32>
    %cst_12 = arith.constant 0.000000e+00 : f32
    %14 = vector.broadcast %cst_12 : f32 to vector<4x1xf32>
    %15 = arith.maximumf %13, %14 : vector<4x1xf32>
    %cst_13 = arith.constant dense<0.000000e+00> : vector<64x1xf32>
    %16 = tpu.matmul %12, %15, %cst_13 {dimension_numbers = #tpu.dot_dimension_numbers<[1], [0], [0], [1], [0, 0, 1, 1], [], []>} : vector<64x4xf32>, vector<4x1xf32>, vector<64x1xf32> -> vector<64x1xf32>
    %17 = vector.extract_strided_slice %16 {offsets = [0, 0], sizes = [32, 1], strides = [1, 1]} : vector<64x1xf32> to vector<32x1xf32>
    %18 = vector.extract_strided_slice %16 {offsets = [32, 0], sizes = [32, 1], strides = [1, 1]} : vector<64x1xf32> to vector<32x1xf32>
    %19 = arith.maximumf %17, %18 : vector<32x1xf32>
    %20 = arith.subf %17, %19 : vector<32x1xf32>
    %21 = math.exp %20 : vector<32x1xf32>
    %22 = arith.subf %18, %19 : vector<32x1xf32>
    %23 = math.exp %22 : vector<32x1xf32>
    %24 = arith.addf %21, %23 : vector<32x1xf32>
    %25 = tpu.reciprocal %24 {approx = true} : vector<32x1xf32> -> vector<32x1xf32>
    %26 = arith.mulf %21, %25 : vector<32x1xf32>
    %27 = arith.mulf %23, %25 : vector<32x1xf32>
    %c0_14 = arith.constant 0 : index
    %c0_15 = arith.constant 0 : index
    %c0_16 = arith.constant 0 : index
    %28 = vector.load %arg1[%c0_14, %c0_15, %c0_16] : memref<1x32x64xf32, #tpu.memory_space<vmem>>, vector<1x32x64xf32>
    %29 = vector.shape_cast %28 : vector<1x32x64xf32> to vector<32x64xf32>
    %30 = vector.broadcast %26 : vector<32x1xf32> to vector<32x64xf32>
    %31 = arith.mulf %29, %30 : vector<32x64xf32>
    %c0_17 = arith.constant 0 : index
    %c0_18 = arith.constant 0 : index
    %c0_19 = arith.constant 0 : index
    %32 = vector.load %arg2[%c0_17, %c0_18, %c0_19] : memref<1x32x64xf32, #tpu.memory_space<vmem>>, vector<1x32x64xf32>
    %33 = vector.shape_cast %32 : vector<1x32x64xf32> to vector<32x64xf32>
    %34 = vector.broadcast %27 : vector<32x1xf32> to vector<32x64xf32>
    %35 = arith.mulf %33, %34 : vector<32x64xf32>
    %36 = arith.addf %31, %35 : vector<32x64xf32>
    %c0_20 = arith.constant 0 : index
    %c0_21 = arith.constant 0 : index
    %c0_22 = arith.constant 0 : index
    %37 = vector.load %arg5[%c0_20, %c0_21, %c0_22] : memref<1x32x64xf32, #tpu.memory_space<vmem>>, vector<1x32x64xf32>
    %38 = vector.shape_cast %37 : vector<1x32x64xf32> to vector<32x64xf32>
    %39 = vector.shape_cast %36 : vector<32x64xf32> to vector<1x32x64xf32>
    tpu.vector_store %arg5[%c0_20, %c0_21, %c0_22], %39 {strides = array<i32>} : memref<1x32x64xf32, #tpu.memory_space<vmem>>, vector<1x32x64xf32>,
    return
  }
  func.func @transform_0(%arg0: i32) -> (i32, i32, i32) {
    %c0_i32 = arith.constant 0 : i32
    %c0_i32_0 = arith.constant 0 : i32
    %c0_i32_1 = arith.constant 0 : i32
    return %arg0, %c0_i32, %c0_i32_0 : i32, i32, i32
  }
  func.func @transform_1(%arg0: i32) -> (i32, i32, i32) {
    %c0_i32 = arith.constant 0 : i32
    %c0_i32_0 = arith.constant 0 : i32
    %c0_i32_1 = arith.constant 0 : i32
    return %arg0, %c0_i32, %c0_i32_0 : i32, i32, i32
  }
  func.func @transform_2(%arg0: i32) -> (i32, i32) {
    %c0_i32 = arith.constant 0 : i32
    %c0_i32_0 = arith.constant 0 : i32
    %c0_i32_1 = arith.constant 0 : i32
    return %c0_i32, %c0_i32_0 : i32, i32
  }
  func.func @transform_3(%arg0: i32) -> (i32, i32) {
    %c0_i32 = arith.constant 0 : i32
    %c0_i32_0 = arith.constant 0 : i32
    %c0_i32_1 = arith.constant 0 : i32
    return %c0_i32, %c0_i32_0 : i32, i32
  }
  func.func @transform_4(%arg0: i32) -> (i32, i32, i32) {
    %c0_i32 = arith.constant 0 : i32
    %c0_i32_0 = arith.constant 0 : i32
    %c0_i32_1 = arith.constant 0 : i32
    return %arg0, %c0_i32, %c0_i32_0 : i32, i32, i32
  }
}

</mosaic_0001>

<bundles_post_ra>
// kernel: tpu_custom_call.1
= control target key start
LH: loop header
LB: loop body
LE: loop exit
PB: predicated region body
PF: predicated region fallthrough
CT: control target
= control target key end

     0   :  { %9 = vsyncpa [#allocation3], 0  ;;  %s1231_s0 = inlined_call_operand.vmem [shape: f32[2,32,64], index: 0, kind: input, shape index: {}]   ;;  %s1232_s1 = inlined_call_operand.hbm [shape: f32[2,32,64], index: 1, kind: input, shape index: {}]   ;;  %s1233_s2 = inlined_call_operand.vmem [shape: f32[4,32], index: 2, kind: input, shape index: {}]   ;;  %s1234_s3 = inlined_call_operand.vmem [shape: f32[64,4], index: 3, kind: input, shape index: {}]   ;;  %s1235_s4 = inlined_call_operand.hbm [shape: f32[2,32,64], index: 4, kind: output, shape index: {}]  }
   0x1   :  { %11 = vsyncpa [#allocation3 + $0x1], 0 }
   0x2   :  { %12 = vsyncpa [#allocation4], 0 }
   0x3   :  { %14 = vsyncpa [#allocation4 + $0x1], 0  ;;  %s981_s15 = smov 0   ;;  %s983_s16 = smov 0  }
   0x4   :  { %s985_s17 = smov 0   ;;  %s987_s18 = smov 0  }
   0x5 LB: > { %s1002_s19 = sadd.s32 4294967295, %s944_s18   ;;  %s694_s20 = sadd.s32 4294967294, %s944_s18   ;;  %s944_s18 = sphi %s987_s18, %s1248_s18   ;;  %s940_s17 = sphi %s985_s17, %s1247_s17   ;;  %s936_s16 = sphi %s983_s16, %s1246_s16   ;;  %s932_s15 = sphi %s981_s15, %s1245_s15  }
   0x6   : > { %s1006_s21 = sadd.s32 1, %s944_s18   ;;  %s53_s22 = sadd.s32 1, %s940_s17 }
   0x7   : > { %s50_s23 = ssub.s32 %s944_s18, %s1006_s21  ;;  %p60_p0 = scmp.ne.s32.totalorder %s940_s17, %s936_s16 }
   0x8   : > { %p51_p1 = scmp.eq.s32.totalorder %s50_s23, 0  ;;  %p61_p2 = scmp.eq.s32.totalorder %s944_s18, 0 }
   0x9   : > { %p66_p3 = scmp.ne.s32.totalorder %s936_s16, %s932_s15  ;;  %p67_p4 = scmp.eq.s32.totalorder %s1002_s19, 0 }
   0xa   : > { %s1018_s24 = scalar_select %p51_p1, %s940_s17, %s53_s22  }
   0xb   : > { %p1020_p5 = por %p61_p2, %p60_p0  ;;  %p1024_p6 = por %p67_p4, %p66_p3 }
   0xc   : > { %p132_p7 = scmp.eq.s32.totalorder %s1002_s19, 1  ;;  %p138_p8 = scmp.eq.s32.totalorder %s694_s20, 1 }
   0xd   : > { %p780_p10 = scmp.lt.s32.totalorder %s944_s18, 2  ;;  %s172_s29 = sand.u32 1, %s940_s17  }
   0xe   : > { %p1031_p11 = por %p132_p7, %p60_p0  ;;  %p1035_p12 = por %p138_p8, %p66_p3 }
   0xf   : > { %s720_s30 = sshll.u32 %s944_s18, 9  ;;  %s697_s5 = sshll.u32 %s172_s29, 5 }
  0x10   : > { %s1239_s27 = scalar_select %p1031_p11, 1, 0 }
  0x11   : > { %s1240_s28 = scalar_select %p1035_p12, 1, 0 }
  0x12   : > { %s1044_s8 = scalar_lea.hbm %s1232_s1, %s720_s30  ;;  %s176_s9 = scalar_lea.vmem [#allocation2], %s697_s5 }
  0x13   : > { %s183_s10 = sshll.u32 %s176_s9, 4  ;;  %p1048_p13 = pnand %p780_p10, %p1020_p5  ;;  %s1052_s10 = int_to_ptr.vmem [resolvable:$true] %s183_s10 }
  0x14   : > { %s1054_s12 = scalar_lea.sflag [#allocation3], %s172_s29  ;;  %s848_s13 = scalar_lea.hbm %s1044_s8, 512 }
  0x15   : > { %p849_p0 = scmp.ne.s32.totalorder %s1044_s8, %s848_s13  ;;  %p850_p1 = pneg %p1048_p13 }
  0x16   : > { %s853_s22 = scalar_lea.hbm %s1232_s1, 1024  ;;  %p854_p4 = scmp.lt.u32.totalorder %s1044_s8, %s1232_s1 }
  0x17   : > { %p851_p2 = pnand %p850_p1, %p849_p0  ;;  %p855_p5 = scmp.lt.u32.totalorder %s853_s22, %s848_s13 }
  0x18   : > { %p857_p8 = scmp.lt.u32.totalorder %s848_s13, %s1044_s8 }
  0x19   : > { %p852_p3 = pneg %p851_p2  ;;  %p856_p7 = por %p855_p5, %p854_p4 }
  0x1b   : > { %p858_p10 = por %p857_p8, %p856_p7 }
  0x1d   : > { %p859_p9 = pnand %p858_p10, %p852_p3 }
  0x1f   : > { %862 = shalt.err (!%p859_p9)
}
  0x20   : > { %s863_s29 = scalar_lea.vmem %s1052_s10, 512  ;;  %s946_s30 = smov [#allocation2]  }
  0x21   : > { %p864_p0 = scmp.ne.s32.totalorder %s1052_s10, %s863_s29  ;;  %s868_s5 = sshll.u32 %s946_s30, 4  ;;  %s869_s5 = int_to_ptr.vmem [resolvable:$false] %s868_s5 }
  0x22   : > { %s870_s6 = scalar_lea.vmem %s869_s5, 1024  ;;  %p871_p11 = scmp.lt.s32.totalorder %s1052_s10, %s869_s5 }
  0x23   : > { %p866_p2 = pnand %p864_p0, %p850_p1  ;;  %p872_p4 = scmp.lt.s32.totalorder %s870_s6, %s863_s29 }
  0x25   : > { %p867_p12 = pneg %p866_p2  ;;  %p873_p5 = por %p872_p4, %p871_p11 }
  0x27   : > { %p874_p7 = pnand %p873_p5, %p867_p12 }
  0x29   : > { %877 = shalt.err (!%p874_p7)
}
  0x2a   : > { %s947_s7 = smov 128   ;;  %s948_s9 = smov 8  }
  0x2b   : > { %775 = dma.hbm_to_vmem [thread:$0]  (!%p1048_p13), %s1044_s8, 512, %s1052_s10, %s1054_s12, %s947_s7, %s947_s7, %s948_s9  }
  0x2c   : > { %p700_p9 = scmp.ge.s32.totalorder %s944_s18, 1  ;;  %p191_p1 = scmp.lt.s32.totalorder %s944_s18, 3 }
  0x2e   : > { %p192_p3 = pnand %p700_p9, %p191_p1 }
  0x2f   : > { %s1085_s13 = sand.u32 (!%p192_p3), 1, %s936_s16  }
  0x30   : > { %195 = sbr.rel (%p192_p3) target bundleno = 867 (0x363), region = 36  ;;  %s701_s14 = sshll.u32 (!%p192_p3), %s1085_s13, 5 }
  0x31   : > { %s198_s20 = scalar_lea.sflag (!%p192_p3), [#allocation3], %s1085_s13  ;;  %s201_s22 = scalar_lea.vmem (!%p192_p3), [#allocation2], %s701_s14 }
  0x37   : > { %923 = dma.done.wait (%p1024_p6), %s198_s20, 512  }
  0x38   : > { %925 = vsyncadd (%p1024_p6), %s198_s20, 4294966784  ;;  %p231_p11 = scmp.lt.s32.totalorder %s1002_s19, 1  ;;  %vm240_vm0 = vcmask 523264   ;;  %v1100_v0 = vld [vmem:[%s201_s22] sm:$0xff]  ;;  %v1104_v2 = vld [vmem:[%s201_s22 + $0x8] sm:$0xff]  ;;  %v949_v16 = vmov 0.0|0.0  }
  0x39   : > { %v257_v3 = vsel %vm240_vm0, %v1100_v0, 0.0  ;;  %v260_v6 = vsel %vm240_vm0, %v1104_v2, 0.0  ;;  %v1124_v12 = vld [vmem:[%s201_s22 + $0x18] sm:$0xff]  ;;  %v1126_v13 = vld [vmem:[%s201_s22 + $0x10] sm:$0xff]  ;;  %762 = vmatprep.subr.bf16.mxu0 %v949_v16  ;;  %vm950_vm1 = vmmov 0   ;;  %v951_v17 = vmov 0.0  }
  0x3a   : > { %s232_s8 = scalar_select %p231_p11, %s1002_s19, 1  ;;  %258 = vadd.xlane.f32.xlu1 %v257_v3  ;;  %v266_v14 = vsel %vm240_vm0, %v1124_v12, 0.0  ;;  %v263_v15 = vsel %vm240_vm0, %v1126_v13, 0.0  ;;  %745 = vmatprep.mubr.msk.f32.mxu0 %vm950_vm1, %v951_v17  ;;  %v277_v36 = vld [vmem:[%s1233_s2] sm:$0xf]  ;;  %vm286_vm2 = vcmask 261120  }
  0x3b   : > { %v278_v37 = vld [vmem:[%s1234_s3] sm:$0xff]  ;;  %vm361_vm3 = vcmask 31744   ;;  %vm386_vm4 = vcmask 1043456   ;;  %v279_v41 = vld [vmem:[%s1234_s3 + $0x8] sm:$0xff]  ;;  %v280_v42 = vld [vmem:[%s1234_s3 + $0x10] sm:$0xff]  ;;  %v952_v48 = vmov 0  }
  0x3c   : > { %s721_s10 = sshll.u32 %s232_s8, 5  ;;  %750 = vmatprep.mubr.msk.f32.mxu1 %vm361_vm3, %v278_v37  ;;  %v281_v43 = vld [vmem:[%s1234_s3 + $0x18] sm:$0xff]  ;;  %v282_v44 = vld [vmem:[%s1234_s3 + $0x20] sm:$0xff]  ;;  %v283_v45 = vld [vmem:[%s1234_s3 + $0x28] sm:$0xff]  ;;  %823 = vset.pattern.permute.xlu1 %v952_v48  ;;  %s230_s30 = scalar_lea.vmem [#allocation5], %s701_s14 }
  0x3d   : > { %s235_s23 = scalar_lea.vmem %s1231_s0, %s721_s10  ;;  %v284_v46 = vld [vmem:[%s1234_s3 + $0x30] sm:$0xff]  ;;  %v285_v47 = vld [vmem:[%s1234_s3 + $0x38] sm:$0xff]  ;;  %822 = vset.pattern.permute.xlu0 %v952_v48  ;;  %s609_s5 = sshll.u32 %s230_s30, 4  ;;  %s1178_s5 = int_to_ptr.vmem [resolvable:$true] %s609_s5 }
  0x3e   : > { %v1102_v1 = vld [vmem:[%s235_s23] sm:$0xff]  ;;  %v1110_v5 = vld [vmem:[%s235_s23 + $0x8] sm:$0xff]  ;;  %v1116_v8 = vld [vmem:[%s235_s23 + $0x18] sm:$0xff]  ;;  %261 = vadd.xlane.f32.xlu1 %v260_v6  ;;  %s722_s6 = sshll.u32 %s1002_s19, 9  ;;  %s596_s19 = scalar_lea.sflag [#allocation4], %s1085_s13 }
  0x3f   : > { %v241_v4 = vsel %vm240_vm0, %v1102_v1, 0.0  ;;  %v244_v7 = vsel %vm240_vm0, %v1110_v5, 0.0  ;;  %v1118_v9 = vld [vmem:[%s235_s23 + $0x10] sm:$0xff]  ;;  %v250_v10 = vsel %vm240_vm0, %v1116_v8, 0.0  ;;  %s1186_s9 = scalar_lea.hbm %s1235_s4, %s722_s6  ;;  %s878_s20 = scalar_lea.vmem %s1178_s5, 512 }
  0x40   : > { %242 = vadd.xlane.f32.xlu0 %v241_v4  ;;  %v247_v11 = vsel %vm240_vm0, %v1118_v9, 0.0  ;;  %p879_p6 = scmp.ne.s32.totalorder %s1178_s5, %s878_s20  ;;  %p1242_p12 = scmp.ne.s32.totalorder %s1239_s27, 0 }
  0x41   : > { %s953_s22 = smov [#allocation5]  }
  0x42   : > { %251 = vadd.xlane.f32.xlu1 %v250_v10  ;;  %p880_p13 = pnand %p879_p6, %p1242_p12  ;;  %s882_s8 = sshll.u32 %s953_s22, 4  ;;  %s883_s8 = int_to_ptr.vmem [resolvable:$false] %s882_s8 }
  0x43   : > { %s884_s10 = scalar_lea.vmem %s883_s8, 1024  ;;  %p885_p10 = scmp.lt.s32.totalorder %s1178_s5, %s883_s8 }
  0x44   : > { %245 = vadd.xlane.f32.xlu0 %v244_v7  ;;  %p881_p8 = pneg %p880_p13  ;;  %p886_p0 = scmp.lt.s32.totalorder %s884_s10, %s878_s20 }
  0x46   : > { %267 = vadd.xlane.f32.xlu1 %v266_v14  ;;  %p887_p2 = por %p886_p0, %p885_p10 }
  0x48   : > { %248 = vadd.xlane.f32.xlu0 %v247_v11  ;;  %p888_p4 = pnand %p887_p2, %p881_p8 }
  0x4c   : > { %264 = vadd.xlane.f32.xlu0 %v263_v15 }
  0xc7   : > { %v259_v18 = vpop.xlane.xlu1 %258 }
  0xcb   : > { %v262_v21 = vpop.xlane.xlu1 %261 }
  0xcd   : > { %v243_v19 = vpop.xlane.xlu0 %242 }
  0xce   : > { %v269_v20 = vadd.f32 %v259_v18, %v243_v19 }
  0xcf   : > { %v252_v26 = vpop.xlane.xlu1 %251 }
  0xd0   : > { %v273_v24 = vmul.f32 0.015625, %v269_v20 }
  0xd1   : > { %v246_v22 = vpop.xlane.xlu0 %245 }
  0xd2   : > { %v270_v23 = vadd.f32 %v262_v21, %v246_v22 }
  0xd3   : > { %v268_v29 = vpop.xlane.xlu1 %267 }
  0xd4   : > { %v274_v25 = vmul.f32 0.015625, %v270_v23  ;;  %v272_v31 = vadd.f32 %v268_v29, %v252_v26 }
  0xd5   : > { %v249_v27 = vpop.xlane.xlu0 %248 }
  0xd6   : > { %v763_v28 = vpack.c.bf16 %v274_v25, %v273_v24  ;;  %v276_v33 = vmul.f32 0.015625, %v272_v31 }
  0xd8   : > { %764 = vmatpush3.bf16.msra.mxu0 %v763_v28 }
  0xd9   : > { %v265_v30 = vpop.xlane.xlu0 %264  ;;  %765 = vmatprep.subr.bf16.mxu0 %v949_v16 }
  0xda   : > { %v271_v32 = vadd.f32 %v265_v30, %v249_v27 }
  0xdc   : > { %v275_v34 = vmul.f32 0.015625, %v271_v32 }
  0xde   : > { %v766_v35 = vpack.c.bf16 %v276_v33, %v275_v34 }
  0xe0   : > { %767 = vmatpush3.bf16.msra.mxu0 %v766_v35 }
  0xe3   : > { %746 = vmatmul.mubr.msk.f32.vlgmr.msra.gmra.mrb[0].mxu0 %vm286_vm2, %v277_v36 }
 0x1b6   : > { %v356_v38 = vpop.f32.mrb[0].mxu0 }
 0x1b7   : > { %v360_v39 = vmax.f32 %v356_v38, 0.0  ;;  %v747_v40 = vpop.f32.mrb[1].mxu0 }
 0x1b9   : > { %748 = vmatprep.subr.msk.mxu1 %vm386_vm4, %v360_v39 }
 0x1ba   : > { %749 = vmatpush3.msk.msra.mxu1 %vm386_vm4, %v360_v39 }
 0x1bb   : > { %751 = vmatmul.mubr.msk.f32.vlgmr.msra.gmra.mrb[0].mxu1 %vm361_vm3, %v279_v41 }
 0x1bc   : > { %753 = vmatprep.mubr.msk.f32.mxu1 %vm361_vm3, %v280_v42 }
 0x1bf   : > { %754 = vmatmul.mubr.msk.f32.gmra.mrb[2].mxu1 %vm361_vm3, %v281_v43 }
 0x1c0   : > { %756 = vmatprep.mubr.msk.f32.mxu1 %vm361_vm3, %v282_v44 }
 0x1c3   : > { %757 = vmatmul.mubr.msk.f32.gmra.mrb[4].mxu1 %vm361_vm3, %v283_v45 }
 0x1c4   : > { %759 = vmatprep.mubr.msk.f32.mxu1 %vm361_vm3, %v284_v46 }
 0x1c7   : > { %760 = vmatmul.mubr.msk.f32.gmra.mrb[6].mxu1 %vm361_vm3, %v285_v47 }
 0x28e   : > { %v752_v49 = vpop.f32.mrb[0].mxu1 }
 0x28f   : > { %v456_v50 = vpop.f32.mrb[1].mxu1 }
 0x292   : > { %v755_v51 = vpop.f32.mrb[2].mxu1 }
 0x293   : > { %v466_v52 = vpop.f32.mrb[3].mxu1 }
 0x296   : > { %v758_v53 = vpop.f32.mrb[4].mxu1 }
 0x297   : > { %v496_v54 = vmax.f32 %v752_v49, %v758_v53  ;;  %v476_v55 = vpop.f32.mrb[5].mxu1 }
 0x298   : > { %v495_v56 = vmax.f32 %v456_v50, %v476_v55 }
 0x299   : > { %v500_v57 = vsub.f32 %v752_v49, %v496_v54  ;;  %v512_v58 = vsub.f32 %v758_v53, %v496_v54 }
 0x29a   : > { %v499_v59 = vsub.f32 %v456_v50, %v495_v56  ;;  %v511_v60 = vsub.f32 %v476_v55, %v495_v56  ;;  %v761_v61 = vpop.f32.mrb[6].mxu1 }
 0x29b   : > { %v505_v62 = vmul.f32 1.442695, %v500_v57  ;;  %v517_v63 = vmul.f32 1.442695, %v512_v58  ;;  %v498_v3 = vmax.f32 %v755_v51, %v761_v61  ;;  %v486_v4 = vpop.f32.mrb[7].mxu1 }
 0x29c   : > { %v503_v6 = vmul.f32 1.442695, %v499_v59  ;;  %v515_v7 = vmul.f32 1.442695, %v511_v60  ;;  %v497_v10 = vmax.f32 %v466_v52, %v486_v4 }
 0x29d   : > { %824 = vpow2.f32 %v505_v62  ;;  %v502_v11 = vsub.f32 %v755_v51, %v498_v3  ;;  %v514_v14 = vsub.f32 %v761_v61, %v498_v3 }
 0x29e   : > { %826 = vpow2.f32 %v517_v63  ;;  %v501_v15 = vsub.f32 %v466_v52, %v497_v10  ;;  %v513_v16 = vsub.f32 %v486_v4, %v497_v10 }
 0x29f   : > { %828 = vpow2.f32 %v503_v6  ;;  %v509_v17 = vmul.f32 1.442695, %v502_v11  ;;  %v521_v18 = vmul.f32 1.442695, %v514_v14 }
 0x2a0   : > { %830 = vpow2.f32 %v515_v7  ;;  %v507_v19 = vmul.f32 1.442695, %v501_v15  ;;  %v519_v20 = vmul.f32 1.442695, %v513_v16 }
 0x2a1   : > { %832 = vpow2.f32 %v509_v17 }
 0x2a2   : > { %834 = vpow2.f32 %v521_v18 }
 0x2a3   : > { %836 = vpow2.f32 %v507_v19 }
 0x2a4   : > { %838 = vpow2.f32 %v519_v20 }
 0x2a7   : > { %v825_v21 = vpop.eup %824 }
 0x2a8   : > { %v827_v22 = vpop.eup %826 }
 0x2a9   : > { %v829_v23 = vpop.eup %828  ;;  %v524_v24 = vadd.f32 %v827_v22, %v825_v21 }
 0x2aa   : > { %v831_v25 = vpop.eup %830 }
 0x2ab   : > { %v833_v26 = vpop.eup %832  ;;  %840 = vrcp.f32 %v524_v24  ;;  %v523_v27 = vadd.f32 %v831_v25, %v829_v23 }
 0x2ac   : > { %v835_v28 = vpop.eup %834 }
 0x2ad   : > { %v837_v29 = vpop.eup %836  ;;  %842 = vrcp.f32 %v523_v27  ;;  %v526_v30 = vadd.f32 %v835_v28, %v833_v26 }
 0x2ae   : > { %v839_v31 = vpop.eup %838 }
 0x2af   : > { %844 = vrcp.f32 %v526_v30  ;;  %v525_v32 = vadd.f32 %v839_v31, %v837_v29 }
 0x2b1   : > { %846 = vrcp.f32 %v525_v32 }
 0x2b5   : > { %v841_v33 = vpop.eup %840 }
 0x2b6   : > { %v532_v34 = vmul.f32 %v841_v33, %v825_v21  ;;  %v536_v35 = vmul.f32 %v841_v33, %v827_v22 }
 0x2b7   : > { %v843_v36 = vpop.eup %842 }
 0x2b8   : > { %546 = vperm.xlu1 %823, %v532_v34   ;;  %v531_v37 = vmul.f32 %v843_v36, %v829_v23  ;;  %v535_v38 = vmul.f32 %v843_v36, %v831_v25 }
 0x2b9   : > { %v845_v39 = vpop.eup %844 }
 0x2ba   : > { %541 = vperm.xlu0 %822, %v531_v37   ;;  %v534_v40 = vmul.f32 %v845_v39, %v833_v26  ;;  %v538_v41 = vmul.f32 %v845_v39, %v835_v28 }
 0x2bb   : > { %v847_v42 = vpop.eup %846 }
 0x2bc   : > { %570 = vperm.xlu1 %823, %v536_v35   ;;  %v533_v43 = vmul.f32 %v847_v42, %v837_v29  ;;  %v537_v44 = vmul.f32 %v847_v42, %v839_v31 }
 0x2c0   : > { %565 = vperm.xlu1 %823, %v535_v38  }
 0x2c4   : > { %556 = vperm.xlu1 %823, %v534_v40  }
 0x2c8   : > { %551 = vperm.xlu1 %823, %v533_v43  }
 0x2cc   : > { %575 = vperm.xlu1 %823, %v537_v44  }
 0x2d0   : > { %580 = vperm.xlu1 %823, %v538_v41  }
 0x337   : > { %v547_v45 = vpop.permute.xlu1 %546 }
 0x338   : > { %v560_v47 = vmul.f32 %v547_v45, %v1110_v5 }
 0x339   : > { %v542_v49 = vpop.permute.xlu0 %541 }
 0x33a   : > { %v559_v52 = vmul.f32 %v542_v49, %v1102_v1 }
 0x33b   : > { %v571_v46 = vpop.permute.xlu1 %570 }
 0x33c   : > { %v584_v48 = vmul.f32 %v571_v46, %v1104_v2 }
 0x33e   : > { %v588_v50 = vadd.f32 %v584_v48, %v560_v47 }
 0x33f   : > { %v566_v51 = vpop.permute.xlu1 %565 }
 0x340   : > { %592 = vst.msk [vmem:[%s230_s30 + $0x8] sm:$0xff] %vm240_vm0, %v588_v50  ;;  %v583_v53 = vmul.f32 %v566_v51, %v1100_v0 }
 0x342   : > { %v587_v54 = vadd.f32 %v583_v53, %v559_v52 }
 0x343   : > { %v557_v55 = vpop.permute.xlu1 %556 }
 0x344   : > { %591 = vst.msk [vmem:[%s230_s30] sm:$0xff] %vm240_vm0, %v587_v54  ;;  %v562_v0 = vmul.f32 %v557_v55, %v1116_v8 }
 0x347   : > { %v552_v5 = vpop.permute.xlu1 %551 }
 0x348   : > { %v561_v2 = vmul.f32 %v552_v5, %v1118_v9 }
 0x34b   : > { %v576_v56 = vpop.permute.xlu1 %575 }
 0x34c   : > { %v585_v57 = vmul.f32 %v576_v56, %v1126_v13 }
 0x34e   : > { %v589_v1 = vadd.f32 %v585_v57, %v561_v2 }
 0x34f   : > { %v581_v58 = vpop.permute.xlu1 %580 }
 0x350   : > { %593 = vst.msk [vmem:[%s230_s30 + $0x10] sm:$0xff] %vm240_vm0, %v589_v1  ;;  %v586_v59 = vmul.f32 %v581_v58, %v1124_v12 }
 0x352   : > { %v590_v9 = vadd.f32 %v586_v59, %v562_v0 }
 0x354   : > { %594 = vst.msk [vmem:[%s230_s30 + $0x18] sm:$0xff] %vm240_vm0, %v590_v9 }
 0x355   : > { %891 = shalt.err (!%p888_p4)
}
 0x356   : > { %s892_s11 = scalar_lea.hbm %s1186_s9, 512  ;;  %s896_s26 = scalar_lea.hbm %s1235_s4, 1024 }
 0x357   : > { %p893_p5 = scmp.ne.s32.totalorder %s1186_s9, %s892_s11  ;;  %p897_p1 = scmp.lt.u32.totalorder %s1186_s9, %s1235_s4 }
 0x358   : > { %p898_p3 = scmp.lt.u32.totalorder %s896_s26, %s892_s11  ;;  %p900_p6 = scmp.lt.u32.totalorder %s892_s11, %s1186_s9 }
 0x359   : > { %p894_p7 = pnand %p893_p5, %p1242_p12 }
 0x35a   : > { %p899_p11 = por %p898_p3, %p897_p1 }
 0x35b   : > { %p895_p9 = pneg %p894_p7 }
 0x35c   : > { %p901_p13 = por %p900_p6, %p899_p11 }
 0x35e   : > { %p902_p8 = pnand %p901_p13, %p895_p9 }
 0x360   : > { %905 = shalt.err (!%p902_p8)
}
 0x361   : > { %s954_s30 = smov 128   ;;  %s955_s6 = smov 8  }
 0x362   : > { %770 = dma.vmem_to_hbm [thread:$0]  (%p1242_p12), %s1178_s5, 512, %s1186_s9, %s596_s19, %s954_s30, %s954_s30, %s955_s6  }
 0x363 PF: > { %s624_s14 = sand.u32 1, %s932_s15   ;;  %p1243_p10 = scmp.ne.s32.totalorder %s1240_s28, 0 }
 0x364   : > { %p1244_p0 = scmp.ge.s32.totalorder %s944_s18, 2  ;;  %s625_s7 = scalar_lea.sflag [#allocation4], %s624_s14 }
 0x366   : > { %p777_p2 = pnand %p1244_p0, %p1243_p10 }
 0x368   : > { %927 = dma.done.wait (!%p777_p2), %s625_s7, 512  }
 0x369   : > { %929 = vsyncadd (!%p777_p2), %s625_s7, 4294966784  ;;  %p17_p4 = scmp.ge.s32.totalorder %s1006_s21, 4   ;;  %s1245_s15 = smov %s936_s16 }
 0x36a   : > { %s1246_s16 = smov %s940_s17  ;;  %s1247_s17 = smov %s1018_s24 }
 0x36b   : > { %s1248_s18 = smov %s1006_s21  ;;  %19 = sbr.rel (!%p17_p4) target bundleno = 5 (0x5), region = 84 }
 0x372   :  { %630 = vsyncpa [#allocation3], 1 }
 0x373   :  { %632 = vsyncpa [#allocation3 + $0x1], 1 }
 0x374   :  { %633 = vsyncpa [#allocation4], 1 }
 0x375   :  { %635 = vsyncpa [#allocation4 + $0x1], 1 }

</bundles_post_ra>
